<compile_context>
chip_gen: v7x
topology: tpu7x:2x2x1
jax: 0.10.0
libtpu: 0.0.40
codegen_flags: <defaults>
</compile_context>

<pallas_src>
import functools

import jax
import jax.numpy as jnp
from jax.experimental import pallas as pl
from jax.experimental.pallas import tpu as pltpu

LAYER_NORM_EPS = 1e-12


def _round_up(x, m):
    return (x + m - 1) // m * m


def _vmem_capacity_bytes():
    """Per-core VMEM capacity; conservative fallback if the query is unavailable."""
    try:
        info = pltpu.get_tpu_info()
        cap = getattr(info, "vmem_capacity_bytes", None)
        if cap:
            return int(cap)
    except Exception:
        pass
    return 64 << 20  # v7x per-TC VMEM (smallest across v5e/v6e/v7x)


def _resident_spec(block_shape, index_map):
    """Spec for a grid-invariant operand: single-buffered to save VMEM.

    Falls back to a plain (double-buffered) BlockSpec if this JAX build does
    not support `pipeline_mode` on BlockSpec.
    """
    try:
        return pl.BlockSpec(block_shape, index_map, pipeline_mode=pl.Buffered(1))
    except TypeError:
        return pl.BlockSpec(block_shape, index_map)


def bert_output_kernel(x_ref, w_ref, b_ref, res_ref, gamma_ref, beta_ref, o_ref,
                       *, eps, mm_dtype):
    # Dense: [tm, I] @ [I, H] on the MXU with f32 accumulation.  The activation
    # tile is cast to the matmul dtype here (VPU cast hidden under MXU work) so
    # the wrapper never does a standalone HBM cast pass.
    x = x_ref[...].astype(mm_dtype)
    h = jnp.dot(x, w_ref[...], preferred_element_type=jnp.float32)

    # bias + residual add (dropout is eval-mode identity)
    # TODO(synk): training-mode dropout would need pltpu.prng_seed/prng_random_bits masking
    h = h + b_ref[...] + res_ref[...].astype(jnp.float32)

    # One-pass LayerNorm over the hidden (lane) axis; variance clamped at 0 so
    # E[x^2] - E[x]^2 cannot round to a tiny negative and NaN the rsqrt.
    inv_h = 1.0 / h.shape[-1]
    sum_h = jnp.sum(h, axis=-1, keepdims=True)
    sum_h2 = jnp.sum(h * h, axis=-1, keepdims=True)
    mean = sum_h * inv_h
    var = jnp.maximum(sum_h2 * inv_h - mean * mean, 0.0)
    normed = (h - mean) * jax.lax.rsqrt(var + eps)
    o_ref[...] = (normed * gamma_ref[...] + beta_ref[...]).astype(o_ref.dtype)


def bert_output(hidden_states, input_tensor, weight, bias, gamma, beta, *,
                tm=512, use_bf16_matmul=True, eps=LAYER_NORM_EPS):
    """hidden_states: [B, S, I], input_tensor: [B, S, H] -> [B, S, H].

    Note: use_bf16_matmul=True (bf16 MXU operands, f32 accumulation) diverges
    slightly from a strict f32 PyTorch BertOutput; pass False for exact parity.
    """
    B, S, I = hidden_states.shape
    H = input_tensor.shape[-1]
    T = B * S
    out_dtype = hidden_states.dtype

    mm_dtype = jnp.bfloat16 if use_bf16_matmul else hidden_states.dtype

    # No pad / cast / slice passes over HBM: activation and residual stay in
    # their source dtypes, and the ragged last row tile (T % tm != 0) is
    # handled by Pallas with a masked store.
    x = hidden_states.reshape(T, I)
    res = input_tensor.reshape(T, H)
    w = weight.astype(mm_dtype)                    # one-time cast, resident in VMEM
    b2 = bias.reshape(1, H).astype(jnp.float32)
    g2 = gamma.reshape(1, H).astype(jnp.float32)
    be2 = beta.reshape(1, H).astype(jnp.float32)

    x_b = jnp.dtype(x.dtype).itemsize
    w_b = jnp.dtype(w.dtype).itemsize
    res_b = jnp.dtype(res.dtype).itemsize
    out_b = jnp.dtype(out_dtype).itemsize

    # Clamp the row tile for tiny inputs (sublane-aligned), then shrink it if
    # the double-buffered streaming tiles + resident weight would not fit the
    # per-core VMEM of the current TPU generation.
    tm = max(8, min(tm, _round_up(T, 8)))
    budget = int(0.75 * _vmem_capacity_bytes())

    def _needed(tm_):
        # double-buffered x/res/out tiles + single-buffered weight + LN params
        return (2 * (tm_ * I * x_b + tm_ * H * res_b + tm_ * H * out_b)
                + I * H * w_b + 3 * H * 4)

    while tm > 64 and _needed(tm) + (4 << 20) > budget:
        tm = max(64, tm // 2)

    vmem_limit = int(max(min(_needed(tm) + (8 << 20), budget), min(32 << 20, budget)))

    grid = (pl.cdiv(T, tm),)
    # TODO(synk): if I (the contraction dim) grows well beyond BERT sizes (>8K),
    # add a K grid axis with a (tm, H) f32 accumulator instead of resident W.

    cost = pl.CostEstimate(
        flops=2 * T * I * H + 10 * T * H,
        transcendentals=T,
        bytes_accessed=(T * I * x_b + I * H * w_b + T * H * res_b
                        + T * H * out_b + 3 * H * 4),
    )

    out = pl.pallas_call(
        functools.partial(bert_output_kernel, eps=eps, mm_dtype=mm_dtype),
        out_shape=jax.ShapeDtypeStruct((T, H), out_dtype),
        grid_spec=pltpu.PrefetchScalarGridSpec(
            num_scalar_prefetch=0,
            grid=grid,
            in_specs=[
                pl.BlockSpec((tm, I), lambda i: (i, 0)),    # activation tile (source dtype)
                _resident_spec((I, H), lambda i: (0, 0)),   # full weight, single-buffered
                _resident_spec((1, H), lambda i: (0, 0)),   # bias
                pl.BlockSpec((tm, H), lambda i: (i, 0)),    # residual tile
                _resident_spec((1, H), lambda i: (0, 0)),   # LN gamma
                _resident_spec((1, H), lambda i: (0, 0)),   # LN beta
            ],
            out_specs=pl.BlockSpec((tm, H), lambda i: (i, 0)),
        ),
        compiler_params=pltpu.CompilerParams(
            dimension_semantics=("parallel",),   # row axis shards across v7x's 2 TCs
            vmem_limit_bytes=vmem_limit,
        ),
        cost_estimate=cost,
    )(x, w, b2, res, g2, be2)

    return out.reshape(B, S, H)


if __name__ == "__main__":
    # small BERT-like config
    batch, seq = 2, 8
    intermediate_size, hidden_size = 256, 128

    key = jax.random.PRNGKey(0)
    k1, k2, k3, k4, k5 = jax.random.split(key, 5)

    hidden_states = jax.random.normal(k1, (batch, seq, intermediate_size), jnp.float32)
    input_tensor = jax.random.normal(k2, (batch, seq, hidden_size), jnp.float32)

    # deterministic parameter init (synthetic, not a checkpoint)
    weight = jax.random.normal(k3, (intermediate_size, hidden_size), jnp.float32) * 0.02
    bias = jax.random.normal(k4, (hidden_size,), jnp.float32) * 0.02
    gamma = jnp.ones((hidden_size,), jnp.float32)
    beta = jnp.zeros((hidden_size,), jnp.float32)

    out = bert_output(hidden_states, input_tensor, weight, bias, gamma, beta)
    jax.block_until_ready(out)

    # reference check in plain JAX (same bf16 matmul operands, f32 accumulation)
    h = jnp.dot(hidden_states.reshape(-1, intermediate_size).astype(jnp.bfloat16),
                weight.astype(jnp.bfloat16),
                preferred_element_type=jnp.float32) + bias
    h = h + input_tensor.reshape(-1, hidden_size)
    mu = h.mean(-1, keepdims=True)
    var = ((h - mu) ** 2).mean(-1, keepdims=True)
    ref = ((h - mu) / jnp.sqrt(var + LAYER_NORM_EPS)) * gamma + beta
    assert jnp.allclose(out.reshape(-1, hidden_size), ref, atol=2e-3, rtol=2e-3), (
        float(jnp.max(jnp.abs(out.reshape(-1, hidden_size) - ref))))

    print("KERNEL_OK")
</pallas_src>

<mosaic_0001>
module attributes {stable_mosaic.version = 11 : i64} {
  func.func @bert_output_kernel(%arg0: i32, %arg1: memref<16x256xf32, #tpu.memory_space<vmem>>, %arg2: memref<256x128xbf16, #tpu.memory_space<vmem>>, %arg3: memref<1x128xf32, #tpu.memory_space<vmem>>, %arg4: memref<16x128xf32, #tpu.memory_space<vmem>>, %arg5: memref<1x128xf32, #tpu.memory_space<vmem>>, %arg6: memref<1x128xf32, #tpu.memory_space<vmem>>, %arg7: memref<16x128xf32, #tpu.memory_space<vmem>>) attributes {dimension_semantics = [#tpu.dimension_semantics<parallel>], iteration_bounds = array<i64: 1>, scalar_prefetch = 0 : i64, scratch_operands = 0 : i64, tpu.core_type = #tpu.core_type<tc>, window_params = [{transform_indices = @transform_0, window_bounds = array<i64: 16, 256>}, {pipeline_mode = #tpu.pipeline_mode<synchronous>, transform_indices = @transform_1, window_bounds = array<i64: 256, 128>}, {pipeline_mode = #tpu.pipeline_mode<synchronous>, transform_indices = @transform_2, window_bounds = array<i64: 1, 128>}, {transform_indices = @transform_3, window_bounds = array<i64: 16, 128>}, {pipeline_mode = #tpu.pipeline_mode<synchronous>, transform_indices = @transform_4, window_bounds = array<i64: 1, 128>}, {pipeline_mode = #tpu.pipeline_mode<synchronous>, transform_indices = @transform_5, window_bounds = array<i64: 1, 128>}, {transform_indices = @transform_6, window_bounds = array<i64: 16, 128>}]} {
    %c0 = arith.constant 0 : index
    %c0_0 = arith.constant 0 : index
    %0 = vector.load %arg1[%c0, %c0_0] : memref<16x256xf32, #tpu.memory_space<vmem>>, vector<16x256xf32>
    %1 = arith.truncf %0 : vector<16x256xf32> to vector<16x256xbf16>
    %c0_1 = arith.constant 0 : index
    %c0_2 = arith.constant 0 : index
    %2 = vector.load %arg2[%c0_1, %c0_2] : memref<256x128xbf16, #tpu.memory_space<vmem>>, vector<256x128xbf16>
    %cst = arith.constant dense<0.000000e+00> : vector<16x128xf32>
    %3 = tpu.matmul %1, %2, %cst {dimension_numbers = #tpu.dot_dimension_numbers<[1], [0], [0], [1], [0, 0, 1, 1], [], []>} : vector<16x256xbf16>, vector<256x128xbf16>, vector<16x128xf32> -> vector<16x128xf32>
    %c0_3 = arith.constant 0 : index
    %c0_4 = arith.constant 0 : index
    %4 = vector.load %arg3[%c0_3, %c0_4] : memref<1x128xf32, #tpu.memory_space<vmem>>, vector<1x128xf32>
    %5 = vector.broadcast %4 : vector<1x128xf32> to vector<16x128xf32>
    %6 = arith.addf %3, %5 : vector<16x128xf32>
    %c0_5 = arith.constant 0 : index
    %c0_6 = arith.constant 0 : index
    %7 = vector.load %arg4[%c0_5, %c0_6] : memref<16x128xf32, #tpu.memory_space<vmem>>, vector<16x128xf32>
    %8 = arith.addf %6, %7 : vector<16x128xf32>
    %cst_7 = arith.constant dense<0.000000e+00> : vector<16xf32>
    %9 = vector.multi_reduction <add>, %8, %cst_7 [1] : vector<16x128xf32> to vector<16xf32>
    %10 = vector.shape_cast %9 : vector<16xf32> to vector<16x1xf32>
    %11 = arith.mulf %8, %8 : vector<16x128xf32>
    %cst_8 = arith.constant dense<0.000000e+00> : vector<16xf32>
    %12 = vector.multi_reduction <add>, %11, %cst_8 [1] : vector<16x128xf32> to vector<16xf32>
    %13 = vector.shape_cast %12 : vector<16xf32> to vector<16x1xf32>
    %cst_9 = arith.constant 7.812500e-03 : f32
    %14 = vector.broadcast %cst_9 : f32 to vector<16x1xf32>
    %15 = arith.mulf %10, %14 : vector<16x1xf32>
    %cst_10 = arith.constant 7.812500e-03 : f32
    %16 = vector.broadcast %cst_10 : f32 to vector<16x1xf32>
    %17 = arith.mulf %13, %16 : vector<16x1xf32>
    %18 = arith.mulf %15, %15 : vector<16x1xf32>
    %19 = arith.subf %17, %18 : vector<16x1xf32>
    %cst_11 = arith.constant 0.000000e+00 : f32
    %20 = vector.broadcast %cst_11 : f32 to vector<16x1xf32>
    %21 = arith.maximumf %19, %20 : vector<16x1xf32>
    %22 = vector.broadcast %15 : vector<16x1xf32> to vector<16x128xf32>
    %23 = arith.subf %8, %22 : vector<16x128xf32>
    %cst_12 = arith.constant 9.99999996E-13 : f32
    %24 = vector.broadcast %cst_12 : f32 to vector<16x1xf32>
    %25 = arith.addf %21, %24 : vector<16x1xf32>
    %26 = math.rsqrt %25 : vector<16x1xf32>
    %27 = vector.broadcast %26 : vector<16x1xf32> to vector<16x128xf32>
    %28 = arith.mulf %23, %27 : vector<16x128xf32>
    %c0_13 = arith.constant 0 : index
    %c0_14 = arith.constant 0 : index
    %29 = vector.load %arg5[%c0_13, %c0_14] : memref<1x128xf32, #tpu.memory_space<vmem>>, vector<1x128xf32>
    %30 = vector.broadcast %29 : vector<1x128xf32> to vector<16x128xf32>
    %31 = arith.mulf %28, %30 : vector<16x128xf32>
    %c0_15 = arith.constant 0 : index
    %c0_16 = arith.constant 0 : index
    %32 = vector.load %arg6[%c0_15, %c0_16] : memref<1x128xf32, #tpu.memory_space<vmem>>, vector<1x128xf32>
    %33 = vector.broadcast %32 : vector<1x128xf32> to vector<16x128xf32>
    %34 = arith.addf %31, %33 : vector<16x128xf32>
    %c0_17 = arith.constant 0 : index
    %c0_18 = arith.constant 0 : index
    %35 = vector.load %arg7[%c0_17, %c0_18] : memref<16x128xf32, #tpu.memory_space<vmem>>, vector<16x128xf32>
    tpu.vector_store %arg7[%c0_17, %c0_18], %34 {strides = array<i32>} : memref<16x128xf32, #tpu.memory_space<vmem>>, vector<16x128xf32>,
    return
  }
  func.func @transform_0(%arg0: i32) -> (i32, i32) {
    %c0_i32 = arith.constant 0 : i32
    %c0_i32_0 = arith.constant 0 : i32
    return %arg0, %c0_i32 : i32, i32
  }
  func.func @transform_1(%arg0: i32) -> (i32, i32) {
    %c0_i32 = arith.constant 0 : i32
    %c0_i32_0 = arith.constant 0 : i32
    %c0_i32_1 = arith.constant 0 : i32
    return %c0_i32, %c0_i32_0 : i32, i32
  }
  func.func @transform_2(%arg0: i32) -> (i32, i32) {
    %c0_i32 = arith.constant 0 : i32
    %c0_i32_0 = arith.constant 0 : i32
    %c0_i32_1 = arith.constant 0 : i32
    return %c0_i32, %c0_i32_0 : i32, i32
  }
  func.func @transform_3(%arg0: i32) -> (i32, i32) {
    %c0_i32 = arith.constant 0 : i32
    %c0_i32_0 = arith.constant 0 : i32
    return %arg0, %c0_i32 : i32, i32
  }
  func.func @transform_4(%arg0: i32) -> (i32, i32) {
    %c0_i32 = arith.constant 0 : i32
    %c0_i32_0 = arith.constant 0 : i32
    %c0_i32_1 = arith.constant 0 : i32
    return %c0_i32, %c0_i32_0 : i32, i32
  }
  func.func @transform_5(%arg0: i32) -> (i32, i32) {
    %c0_i32 = arith.constant 0 : i32
    %c0_i32_0 = arith.constant 0 : i32
    %c0_i32_1 = arith.constant 0 : i32
    return %c0_i32, %c0_i32_0 : i32, i32
  }
  func.func @transform_6(%arg0: i32) -> (i32, i32) {
    %c0_i32 = arith.constant 0 : i32
    %c0_i32_0 = arith.constant 0 : i32
    return %arg0, %c0_i32 : i32, i32
  }
}

</mosaic_0001>

<bundles_post_ra>
// kernel: tpu_custom_call.1
= control target key start
LH: loop header
LB: loop body
LE: loop exit
PB: predicated region body
PF: predicated region fallthrough
CT: control target
= control target key end

     0   :  { %11 = vsyncpa [#allocation3], 0  ;;  %s591_s0 = inlined_call_operand.hbm [shape: f32[16,256], index: 0, kind: input, shape index: {}]   ;;  %s592_s1 = inlined_call_operand.hbm [shape: bf16[256,128], index: 1, kind: input, shape index: {}]   ;;  %s593_s2 = inlined_call_operand.vmem [shape: f32[1,128], index: 2, kind: input, shape index: {}]   ;;  %s594_s3 = inlined_call_operand.hbm [shape: f32[16,128], index: 3, kind: input, shape index: {}]   ;;  %s595_s4 = inlined_call_operand.vmem [shape: f32[1,128], index: 4, kind: input, shape index: {}]   ;;  %s596_s5 = inlined_call_operand.vmem [shape: f32[1,128], index: 5, kind: input, shape index: {}]   ;;  %s597_s6 = inlined_call_operand.hbm [shape: f32[16,128], index: 6, kind: output, shape index: {}]  }
   0x1   :  { %12 = vsyncpa [#allocation6], 0 }
   0x2   :  { %13 = vsyncpa [#allocation4], 0  ;;  %s483_s21 = smov [#allocation5]   ;;  %s389_s25 = scalar_lea.hbm %s592_s1, 2048 }
   0x3   :  { %s31_s22 = sshll.u32 %s483_s21, 4  ;;  %p390_p0 = scmp.ne.s32.totalorder %s592_s1, %s389_s25  ;;  %s32_s22 = int_to_ptr.vmem [resolvable:$true] %s31_s22 }
   0x4   :  { %p393_p1 = scmp.lt.u32.totalorder %s389_s25, %s592_s1 }
   0x6   :  { %p395_p2 = pnand %p393_p1, %p390_p0 }
   0x8   :  { %398 = shalt.err (!%p395_p2)
}
   0x9   :  { %s399_s30 = scalar_lea.vmem %s32_s22, 2048  ;;  %p404_p4 = scmp.lt.s32.totalorder %s32_s22, %s32_s22 }
   0xa   :  { %p400_p3 = scmp.ne.s32.totalorder %s32_s22, %s399_s30  ;;  %p405_p5 = scmp.lt.s32.totalorder %s399_s30, %s399_s30 }
   0xc   :  { %p406_p6 = por %p405_p5, %p404_p4 }
   0xe   :  { %p407_p7 = pnand %p406_p6, %p400_p3 }
  0x10   :  { %410 = shalt.err (!%p407_p7)
}
  0x11   :  { %s484_s7 = smov 64   ;;  %s485_s8 = smov 4  }
  0x12   :  { %37 = dma.hbm_to_vmem [thread:$0]  %s592_s1, 2048, %s32_s22, [#allocation6], %s484_s7, %s484_s7, %s485_s8  }
  0x13   :  { %s486_s11 = smov [#allocation2]   ;;  %s411_s15 = scalar_lea.hbm %s591_s0, 512 }
  0x14   :  { %s19_s12 = sshll.u32 %s486_s11, 4  ;;  %p412_p8 = scmp.ne.s32.totalorder %s591_s0, %s411_s15  ;;  %s20_s12 = int_to_ptr.vmem [resolvable:$true] %s19_s12 }
  0x15   :  { %p415_p9 = scmp.lt.u32.totalorder %s411_s15, %s591_s0 }
  0x17   :  { %p417_p10 = pnand %p415_p9, %p412_p8 }
  0x19   :  { %420 = shalt.err (!%p417_p10)
}
  0x1a   :  { %s421_s20 = scalar_lea.vmem %s20_s12, 512  ;;  %p426_p12 = scmp.lt.s32.totalorder %s20_s12, %s20_s12 }
  0x1b   :  { %p422_p11 = scmp.ne.s32.totalorder %s20_s12, %s421_s20  ;;  %p427_p13 = scmp.lt.s32.totalorder %s421_s20, %s421_s20 }
  0x1d   :  { %p428_p0 = por %p427_p13, %p426_p12 }
  0x1f   :  { %p429_p1 = pnand %p428_p0, %p422_p11 }
  0x21   :  { %432 = shalt.err (!%p429_p1)
}
  0x22   :  { %s487_s1 = smov 256   ;;  %s488_s21 = smov 16  }
  0x23   :  { %25 = dma.hbm_to_vmem [thread:$0]  %s591_s0, 512, %s20_s12, [#allocation3], %s487_s1, %s487_s1, %s488_s21  }
  0x24   :  { %s489_s24 = smov [#allocation7]   ;;  %s433_s28 = scalar_lea.hbm %s594_s3, 256 }
  0x25   :  { %s45_s25 = sshll.u32 %s489_s24, 4  ;;  %p434_p2 = scmp.ne.s32.totalorder %s594_s3, %s433_s28  ;;  %s46_s25 = int_to_ptr.vmem [resolvable:$true] %s45_s25 }
  0x26   :  { %p437_p3 = scmp.lt.u32.totalorder %s433_s28, %s594_s3 }
  0x28   :  { %p439_p4 = pnand %p437_p3, %p434_p2 }
  0x2a   :  { %442 = shalt.err (!%p439_p4)
}
  0x2b   :  { %s443_s9 = scalar_lea.vmem %s46_s25, 256  ;;  %p448_p6 = scmp.lt.s32.totalorder %s46_s25, %s46_s25 }
  0x2c   :  { %p444_p5 = scmp.ne.s32.totalorder %s46_s25, %s443_s9  ;;  %p449_p7 = scmp.lt.s32.totalorder %s443_s9, %s443_s9 }
  0x2e   :  { %p450_p8 = por %p449_p7, %p448_p6 }
  0x30   :  { %p451_p9 = pnand %p450_p8, %p444_p5 }
  0x32   :  { %454 = shalt.err (!%p451_p9)
}
  0x33   :  { %s490_s0 = smov 128   ;;  %s491_s10 = smov 8  }
  0x34   :  { %51 = dma.hbm_to_vmem [thread:$0]  %s594_s3, 256, %s46_s25, [#allocation6], %s490_s0, %s490_s0, %s491_s10  }
  0x35   :  { %477 = dma.done.wait [#allocation3], 512  }
  0x36   :  { %478 = vsyncadd [#allocation3], 4294966784 }
  0x37   :  { %479 = dma.done.wait [#allocation6], 2304  }
  0x38   :  { %480 = vsyncadd [#allocation6], 4294964992  ;;  %v369_v0 = vld [vmem:[#allocation5 + $0x40] sm:$0xff]   ;;  %v371_v2 = vld [vmem:[#allocation5 + $0x48] sm:$0xff]   ;;  %s492_s17 = smov [#allocation8]  }
  0x39   :  { %v370_v1 = vld [vmem:[#allocation5] sm:$0xff]   ;;  %337 = vmatprep.subr.bf16.mxu0 %v369_v0  ;;  %v372_v3 = vld [vmem:[#allocation5 + $0x8] sm:$0xff]   ;;  %v373_v4 = vld [vmem:[#allocation5 + $0x50] sm:$0xff]   ;;  %s305_s18 = sshll.u32 %s492_s17, 4  ;;  %s306_s18 = int_to_ptr.vmem [resolvable:$true] %s305_s18 }
  0x3a   :  { %338 = vmatpush3.bf16.msra.mxu0 %v370_v1  ;;  %v374_v5 = vld [vmem:[#allocation5 + $0x10] sm:$0xff]   ;;  %v375_v6 = vld [vmem:[#allocation5 + $0x58] sm:$0xff]   ;;  %v377_v8 = vld [vmem:[#allocation5 + $0x60] sm:$0xff]   ;;  %s455_s19 = scalar_lea.vmem %s306_s18, 256  ;;  %p460_p11 = scmp.lt.s32.totalorder %s306_s18, %s306_s18 }
  0x3b   :  { %339 = vmatprep.subr.bf16.mxu0 %v371_v2  ;;  %v376_v7 = vld [vmem:[#allocation5 + $0x18] sm:$0xff]   ;;  %v378_v9 = vld [vmem:[#allocation5 + $0x20] sm:$0xff]   ;;  %v379_v10 = vld [vmem:[#allocation5 + $0x68] sm:$0xff]   ;;  %p456_p10 = scmp.ne.s32.totalorder %s306_s18, %s455_s19  ;;  %p461_p12 = scmp.lt.s32.totalorder %s455_s19, %s455_s19 }
  0x3c   :  { %v67_v11 = vld [vmem:[#allocation2 + $0x8] sm:$0xff]  ;;  %v69_v12 = vld [vmem:[#allocation2 + $0x18] sm:$0xff]  ;;  %v381_v15 = vld [vmem:[#allocation5 + $0x70] sm:$0xff]  }
  0x3d   :  { %v71_v13 = vpack.c.bf16 %v69_v12, %v67_v11  ;;  %v380_v14 = vld [vmem:[#allocation5 + $0x28] sm:$0xff]   ;;  %v382_v16 = vld [vmem:[#allocation5 + $0x30] sm:$0xff]   ;;  %v383_v17 = vld [vmem:[#allocation5 + $0x78] sm:$0xff]   ;;  %p462_p13 = por %p461_p12, %p460_p11 }
  0x3e   :  { %340 = vmatpush3.bf16.msra.mxu0 %v372_v3  ;;  %v384_v18 = vld [vmem:[#allocation5 + $0x38] sm:$0xff]   ;;  %v66_v19 = vld [vmem:[#allocation2] sm:$0xff]  ;;  %v68_v20 = vld [vmem:[#allocation2 + $0x10] sm:$0xff] }
  0x3f   :  { %341 = vmatprep.subr.bf16.mxu0 %v373_v4  ;;  %239 = vmatprep.mubr.bf16.mxu0 %v71_v13  ;;  %v70_v21 = vpack.c.bf16 %v68_v20, %v66_v19  ;;  %v318_v23 = vld [vmem:[%s593_s2] ss:$0 sm:$0xff]  ;;  %v249_v31 = vld [vmem:[#allocation7 + $0x8] sm:$0xff]  ;;  %p463_p0 = pnand %p462_p13, %p456_p10 }
  0x40   :  { %v248_v28 = vld [vmem:[#allocation7] sm:$0xff] }
  0x41   :  { %v335_v55 = vld [vmem:[%s595_s4] ss:$0 sm:$0xff] }
  0x42   :  { %342 = vmatpush3.bf16.msra.mxu0 %v374_v5  ;;  %v336_v57 = vld [vmem:[%s596_s5] ss:$0 sm:$0xff] }
  0x43   :  { %343 = vmatprep.subr.bf16.mxu0 %v375_v6 }
  0x46   :  { %344 = vmatpush3.bf16.msra.mxu0 %v376_v7 }
  0x47   :  { %345 = vmatprep.subr.bf16.mxu0 %v377_v8 }
  0x4a   :  { %346 = vmatpush3.bf16.msra.mxu0 %v378_v9 }
  0x4b   :  { %347 = vmatprep.subr.bf16.mxu0 %v379_v10 }
  0x4e   :  { %348 = vmatpush3.bf16.msra.mxu0 %v380_v14 }
  0x4f   :  { %349 = vmatprep.subr.bf16.mxu0 %v381_v15 }
  0x52   :  { %350 = vmatpush3.bf16.msra.mxu0 %v382_v16 }
  0x53   :  { %351 = vmatprep.subr.bf16.mxu0 %v383_v17 }
  0x56   :  { %352 = vmatpush3.bf16.msra.mxu0 %v384_v18 }
  0x59   :  { %240 = vmatmul.mubr.bf16.vlgmr.msra.gmra.mrb[0].mxu0 %v70_v21 }
 0x12c   :  { %v353_v22 = vpop.f32.mrb[0].mxu0 }
 0x12d   :  { %v354_v24 = vpop.f32.mrb[1].mxu0 }
 0x12e   :  { %v355_v25 = vadd.f32 %v354_v24, %v353_v22  ;;  %v356_v26 = vpop.f32.mrb[2].mxu0 }
 0x12f   :  { %v357_v27 = vpop.f32.mrb[3].mxu0 }
 0x130   :  { %v242_v29 = vadd.f32 %v355_v25, %v318_v23  ;;  %v358_v30 = vadd.f32 %v357_v27, %v356_v26 }
 0x132   :  { %v245_v32 = vadd.f32 %v358_v30, %v318_v23  ;;  %v250_v33 = vadd.f32 %v248_v28, %v242_v29 }
 0x134   :  { %252 = vadd.xlane.f32.xlu0 %v250_v33  ;;  %v256_v34 = vmul.f32 %v250_v33, %v250_v33  ;;  %v251_v35 = vadd.f32 %v249_v31, %v245_v32 }
 0x136   :  { %258 = vadd.xlane.f32.xlu1 %v256_v34  ;;  %v257_v36 = vmul.f32 %v251_v35, %v251_v35 }
 0x138   :  { %254 = vadd.xlane.f32.xlu0 %v251_v35 }
 0x13a   :  { %260 = vadd.xlane.f32.xlu1 %v257_v36 }
 0x1c1   :  { %v253_v37 = vpop.xlane.xlu0 %252 }
 0x1c2   :  { %v262_v38 = vmul.f32 0.0078125, %v253_v37 }
 0x1c3   :  { %v259_v39 = vpop.xlane.xlu1 %258 }
 0x1c4   :  { %v266_v40 = vmul.f32 %v262_v38, %v262_v38  ;;  %v264_v41 = vmul.f32 0.0078125, %v259_v39  ;;  %v272_v53 = vsub.f32 %v250_v33, %v262_v38 }
 0x1c5   :  { %v255_v42 = vpop.xlane.xlu0 %254 }
 0x1c6   :  { %v268_v43 = vsub.f32 %v264_v41, %v266_v40  ;;  %v263_v44 = vmul.f32 0.0078125, %v255_v42 }
 0x1c7   :  { %v261_v45 = vpop.xlane.xlu1 %260 }
 0x1c8   :  { %v270_v46 = vmax.f32 %v268_v43, 0.0  ;;  %v267_v47 = vmul.f32 %v263_v44, %v263_v44  ;;  %v265_v48 = vmul.f32 0.0078125, %v261_v45  ;;  %v273_v58 = vsub.f32 %v251_v35, %v263_v44 }
 0x1ca   :  { %v274_v49 = vadd.f32 1e-12, %v270_v46  ;;  %v269_v50 = vsub.f32 %v265_v48, %v267_v47 }
 0x1cc   :  { %385 = vrsqrt.f32 %v274_v49  ;;  %v271_v51 = vmax.f32 %v269_v50, 0.0 }
 0x1ce   :  { %v275_v52 = vadd.f32 1e-12, %v271_v51 }
 0x1d0   :  { %387 = vrsqrt.f32 %v275_v52 }
 0x1d6   :  { %v386_v54 = vpop.eup %385 }
 0x1d7   :  { %v278_v56 = vmul.f32 %v386_v54, %v272_v53 }
 0x1d9   :  { %v287_v59 = vmul.f32 %v335_v55, %v278_v56 }
 0x1da   :  { %v388_v60 = vpop.eup %387 }
 0x1db   :  { %v279_v61 = vmul.f32 %v388_v60, %v273_v58  ;;  %v296_v62 = vadd.f32 %v336_v57, %v287_v59 }
 0x1dd   :  { %v288_v63 = vmul.f32 %v335_v55, %v279_v61  ;;  %298 = vst [vmem:[#allocation8] sm:$0xff] %v296_v62 }
 0x1df   :  { %v297_v0 = vadd.f32 %v336_v57, %v288_v63 }
 0x1e1   :  { %299 = vst [vmem:[#allocation8 + $0x8] sm:$0xff] %v297_v0 }
 0x1e2   :  { %466 = shalt.err (!%p463_p0)
}
 0x1e3   :  { %s467_s20 = scalar_lea.hbm %s597_s6, 256 }
 0x1e4   :  { %p468_p1 = scmp.ne.s32.totalorder %s597_s6, %s467_s20  ;;  %p471_p2 = scmp.lt.u32.totalorder %s467_s20, %s597_s6 }
 0x1e6   :  { %p473_p3 = pnand %p471_p2, %p468_p1 }
 0x1e8   :  { %476 = shalt.err (!%p473_p3)
}
 0x1e9   :  { %311 = dma.vmem_to_hbm [thread:$0]  %s306_s18, 256, %s597_s6, [#allocation4], %s490_s0, %s490_s0, %s491_s10  }
 0x1ea   :  { %481 = dma.done.wait [#allocation4], 256  }
 0x1eb   :  { %482 = vsyncadd [#allocation4], 4294967040 }
 0x1ec   :  { %315 = vsyncpa [#allocation3], 1 }
 0x1ed   :  { %316 = vsyncpa [#allocation6], 1 }
 0x1ee   :  { %317 = vsyncpa [#allocation4], 1 }

</bundles_post_ra>
